<compile_context>
chip_gen: v5e
topology: v5e:2x2
jax: 0.10.0
libtpu: 0.0.40
codegen_flags: <defaults>
</compile_context>

<pallas_src>
import jax
import jax.numpy as jnp
from jax import lax
from jax.experimental import pallas as pl
from jax.experimental.pallas import tpu as pltpu


def self_attention_forward(inp, nms_feat, wf, wg, wh, skip_value,
                           *, compute_dtype=jnp.bfloat16):
    """Pallas implementation of SelfAttention.forward((input, nms_feat)).

    compute_dtype: dtype fed to the MXU matmuls (accumulation is always f32).
                   bfloat16 is the fast path on v6e/v7x; float32 is exact.
    """
    feat = nms_feat if nms_feat is not None else inp
    B, C, N = inp.shape
    L = wf.shape[0]
    assert wf.shape == (L, C) and wg.shape == (L, C) and wh.shape == (C, C)

    # Wrapper-side layout plumbing (pure data movement, done once by XLA):
    #   fused weight  : (2L + C, C)  -- one matmul produces f, g and h
    #   feature slab  : (C, B*N)     -- weights are shared across batch
    w_fused = jnp.concatenate([wf, wg, wh], axis=0).astype(compute_dtype)
    feat_slab = jnp.transpose(feat, (1, 0, 2)).reshape(C, B * N).astype(compute_dtype)

    def kernel(skip_ref, inp_ref, feat_ref, w_ref, out_ref):
        feat_v = feat_ref[...]                               # (C, B*N) compute_dtype
        w_v = w_ref[...]                                     # (2L+C, C) compute_dtype

        # Fused 1x1 convs for the whole batch: one MXU matmul, f32 accumulate.
        fgh = jnp.dot(w_v, feat_v,
                      preferred_element_type=jnp.float32)    # (2L+C, B*N) f32
        f = fgh[:L]                                          # (L, B*N)
        g = fgh[L:2 * L]                                     # (L, B*N)
        h = fgh[2 * L:]                                      # (C, B*N)

        skip = skip_ref[0]                                   # scalar (SMEM)
        inp_v = inp_ref[...]                                 # (B, C, N) f32

        o_slabs = []
        for b in range(B):                                   # B is static & small
            lo, hi = b * N, (b + 1) * N
            f_b = f[:, lo:hi].astype(compute_dtype)          # (L, N)
            g_b = g[:, lo:hi].astype(compute_dtype)          # (L, N)
            h_b = h[:, lo:hi].astype(compute_dtype)          # (C, N)

            # s = g^T @ f  -- contract channel dim directly, no transpose.
            s = lax.dot_general(g_b, f_b, (((0,), (0,)), ((), ())),
                                preferred_element_type=jnp.float32)   # (N, N)

            # softmax over keys (last dim), f32
            m = jnp.max(s, axis=-1, keepdims=True)
            e = jnp.exp(s - m)
            beta = e * pl.reciprocal(jnp.sum(e, axis=-1, keepdims=True),
                                     approx=True)

            # o^T = h @ beta^T  -- result already in (C, N) layout.
            o_t = lax.dot_general(h_b, beta.astype(compute_dtype),
                                  (((1,), (1,)), ((), ())),
                                  preferred_element_type=jnp.float32)  # (C, N)
            o_slabs.append(o_t)

        o = jnp.stack(o_slabs, axis=0)                       # (B, C, N) f32
        out_ref[...] = (inp_v + skip * o).astype(out_ref.dtype)

    grid_spec = pltpu.PrefetchScalarGridSpec(
        num_scalar_prefetch=0,
        grid=(1,),                                            # single invocation
        in_specs=[
            pl.BlockSpec(memory_space=pltpu.MemorySpace.SMEM),   # skip (1,)
            pl.BlockSpec((B, C, N), lambda i: (0, 0, 0)),        # input
            pl.BlockSpec((C, B * N), lambda i: (0, 0)),          # feature slab
            pl.BlockSpec((2 * L + C, C), lambda i: (0, 0)),      # fused weight
        ],
        out_specs=pl.BlockSpec((B, C, N), lambda i: (0, 0, 0)),
    )

    return pl.pallas_call(
        kernel,
        out_shape=jax.ShapeDtypeStruct((B, C, N), inp.dtype),
        grid_spec=grid_spec,
        compiler_params=pltpu.CompilerParams(
            dimension_semantics=("arbitrary",)),
    )(skip_value, inp, feat_slab, w_fused)


def reference_forward(inp, nms_feat, wf, wg, wh, skip_value):
    """Pure-JAX reference mirroring the PyTorch forward exactly."""
    feat = nms_feat if nms_feat is not None else inp
    f = jnp.einsum('oc,bcn->bon', wf, feat)
    g = jnp.einsum('oc,bcn->bon', wg, feat)
    h = jnp.einsum('oc,bcn->bon', wh, feat)
    s = jnp.einsum('bon,bom->bnm', g, f)          # g^T @ f
    beta = jax.nn.softmax(s, axis=-1)
    o = jnp.einsum('bnm,bcm->bnc', beta, h)       # beta @ h^T
    o = jnp.transpose(o, (0, 2, 1))               # (B, C, N)
    return inp + skip_value[0] * o


if __name__ == "__main__":
    key = jax.random.PRNGKey(0)
    B, C, N = 2, 32, 16          # feat_dim=32 -> layer = 8
    L = C // 4

    k1, k2, k3, k4 = jax.random.split(key, 4)
    x = jax.random.normal(k1, (B, C, N), dtype=jnp.float32)
    wf = jax.random.normal(k2, (L, C), dtype=jnp.float32) * (1.0 / C) ** 0.5
    wg = jax.random.normal(k3, (L, C), dtype=jnp.float32) * (1.0 / C) ** 0.5
    wh = jax.random.normal(k4, (C, C), dtype=jnp.float32) * (1.0 / C) ** 0.5
    skip_value = jnp.full((1,), 0.03, dtype=jnp.float32)   # SkipParameter init

    # nms_feat is None -> feat = input (matches the PyTorch branch)
    ref = reference_forward(x, None, wf, wg, wh, skip_value)

    # Exact (f32-fed) path: tight tolerance (approx reciprocal error is
    # suppressed by the 0.03 skip scale).
    out_f32 = self_attention_forward(x, None, wf, wg, wh, skip_value,
                                     compute_dtype=jnp.float32)
    out_f32 = jax.block_until_ready(out_f32)
    assert out_f32.shape == (B, C, N)
    assert jnp.allclose(out_f32, ref, atol=2e-3, rtol=2e-3), "f32 mismatch vs reference"

    # Fast path (bf16 MXU operands, f32 accumulation) for v6e/v7x.
    out_bf16 = self_attention_forward(x, None, wf, wg, wh, skip_value,
                                      compute_dtype=jnp.bfloat16)
    out_bf16 = jax.block_until_ready(out_bf16)
    assert jnp.allclose(out_bf16, ref, atol=2e-2, rtol=2e-2), "bf16 mismatch vs reference"

    print("KERNEL_OK")
</pallas_src>

<mosaic_0001>
module attributes {stable_mosaic.version = 11 : i64} {
  func.func @kernel(%arg0: i32, %arg1: memref<1xf32, #tpu.memory_space<smem>>, %arg2: memref<2x32x16xf32, #tpu.memory_space<vmem>>, %arg3: memref<32x32xf32, #tpu.memory_space<vmem>>, %arg4: memref<48x32xf32, #tpu.memory_space<vmem>>, %arg5: memref<2x32x16xf32, #tpu.memory_space<vmem>>) attributes {dimension_semantics = [#tpu.dimension_semantics<arbitrary>], iteration_bounds = array<i64: 1>, scalar_prefetch = 0 : i64, scratch_operands = 0 : i64, tpu.core_type = #tpu.core_type<tc>, window_params = [{transform_indices = @transform_0, window_bounds = array<i64: 1>}, {pipeline_mode = #tpu.pipeline_mode<synchronous>, transform_indices = @transform_1, window_bounds = array<i64: 2, 32, 16>}, {pipeline_mode = #tpu.pipeline_mode<synchronous>, transform_indices = @transform_2, window_bounds = array<i64: 32, 32>}, {pipeline_mode = #tpu.pipeline_mode<synchronous>, transform_indices = @transform_3, window_bounds = array<i64: 48, 32>}, {pipeline_mode = #tpu.pipeline_mode<synchronous>, transform_indices = @transform_4, window_bounds = array<i64: 2, 32, 16>}]} {
    %c0 = arith.constant 0 : index
    %c0_0 = arith.constant 0 : index
    %0 = vector.load %arg3[%c0, %c0_0] : memref<32x32xf32, #tpu.memory_space<vmem>>, vector<32x32xf32>
    %c0_1 = arith.constant 0 : index
    %c0_2 = arith.constant 0 : index
    %1 = vector.load %arg4[%c0_1, %c0_2] : memref<48x32xf32, #tpu.memory_space<vmem>>, vector<48x32xf32>
    %cst = arith.constant dense<0.000000e+00> : vector<48x32xf32>
    %2 = tpu.matmul %1, %0, %cst {dimension_numbers = #tpu.dot_dimension_numbers<[1], [0], [0], [1], [0, 0, 1, 1], [], []>} : vector<48x32xf32>, vector<32x32xf32>, vector<48x32xf32> -> vector<48x32xf32>
    %3 = vector.extract_strided_slice %2 {offsets = [0, 0], sizes = [8, 32], strides = [1, 1]} : vector<48x32xf32> to vector<8x32xf32>
    %4 = vector.extract_strided_slice %2 {offsets = [8, 0], sizes = [8, 32], strides = [1, 1]} : vector<48x32xf32> to vector<8x32xf32>
    %5 = vector.extract_strided_slice %2 {offsets = [16, 0], sizes = [32, 32], strides = [1, 1]} : vector<48x32xf32> to vector<32x32xf32>
    %c0_3 = arith.constant 0 : index
    %6 = memref.load %arg1[%c0_3] : memref<1xf32, #tpu.memory_space<smem>>
    %c0_4 = arith.constant 0 : index
    %c0_5 = arith.constant 0 : index
    %c0_6 = arith.constant 0 : index
    %7 = vector.load %arg2[%c0_4, %c0_5, %c0_6] : memref<2x32x16xf32, #tpu.memory_space<vmem>>, vector<2x32x16xf32>
    %8 = vector.extract_strided_slice %3 {offsets = [0, 0], sizes = [8, 16], strides = [1, 1]} : vector<8x32xf32> to vector<8x16xf32>
    %9 = vector.extract_strided_slice %4 {offsets = [0, 0], sizes = [8, 16], strides = [1, 1]} : vector<8x32xf32> to vector<8x16xf32>
    %10 = vector.extract_strided_slice %5 {offsets = [0, 0], sizes = [32, 16], strides = [1, 1]} : vector<32x32xf32> to vector<32x16xf32>
    %cst_7 = arith.constant dense<0.000000e+00> : vector<16x16xf32>
    %11 = tpu.matmul %9, %8, %cst_7 {dimension_numbers = #tpu.dot_dimension_numbers<[0], [0], [1], [1], [0, 1, 1, 1], [], []>} : vector<8x16xf32>, vector<8x16xf32>, vector<16x16xf32> -> vector<16x16xf32>
    %cst_8 = arith.constant dense<0xFF800000> : vector<16xf32>
    %12 = vector.multi_reduction <maximumf>, %11, %cst_8 [1] : vector<16x16xf32> to vector<16xf32>
    %13 = vector.shape_cast %12 : vector<16xf32> to vector<16x1xf32>
    %14 = vector.broadcast %13 : vector<16x1xf32> to vector<16x16xf32>
    %15 = arith.subf %11, %14 : vector<16x16xf32>
    %16 = math.exp %15 : vector<16x16xf32>
    %cst_9 = arith.constant dense<0.000000e+00> : vector<16xf32>
    %17 = vector.multi_reduction <add>, %16, %cst_9 [1] : vector<16x16xf32> to vector<16xf32>
    %18 = vector.shape_cast %17 : vector<16xf32> to vector<16x1xf32>
    %19 = tpu.reciprocal %18 {approx = true} : vector<16x1xf32> -> vector<16x1xf32>
    %20 = vector.broadcast %19 : vector<16x1xf32> to vector<16x16xf32>
    %21 = arith.mulf %16, %20 : vector<16x16xf32>
    %cst_10 = arith.constant dense<0.000000e+00> : vector<32x16xf32>
    %22 = tpu.matmul %10, %21, %cst_10 {dimension_numbers = #tpu.dot_dimension_numbers<[1], [1], [0], [0], [0, 0, 1, 0], [], []>} : vector<32x16xf32>, vector<16x16xf32>, vector<32x16xf32> -> vector<32x16xf32>
    %23 = vector.extract_strided_slice %3 {offsets = [0, 16], sizes = [8, 16], strides = [1, 1]} : vector<8x32xf32> to vector<8x16xf32>
    %24 = vector.extract_strided_slice %4 {offsets = [0, 16], sizes = [8, 16], strides = [1, 1]} : vector<8x32xf32> to vector<8x16xf32>
    %25 = vector.extract_strided_slice %5 {offsets = [0, 16], sizes = [32, 16], strides = [1, 1]} : vector<32x32xf32> to vector<32x16xf32>
    %cst_11 = arith.constant dense<0.000000e+00> : vector<16x16xf32>
    %26 = tpu.matmul %24, %23, %cst_11 {dimension_numbers = #tpu.dot_dimension_numbers<[0], [0], [1], [1], [0, 1, 1, 1], [], []>} : vector<8x16xf32>, vector<8x16xf32>, vector<16x16xf32> -> vector<16x16xf32>
    %cst_12 = arith.constant dense<0xFF800000> : vector<16xf32>
    %27 = vector.multi_reduction <maximumf>, %26, %cst_12 [1] : vector<16x16xf32> to vector<16xf32>
    %28 = vector.shape_cast %27 : vector<16xf32> to vector<16x1xf32>
    %29 = vector.broadcast %28 : vector<16x1xf32> to vector<16x16xf32>
    %30 = arith.subf %26, %29 : vector<16x16xf32>
    %31 = math.exp %30 : vector<16x16xf32>
    %cst_13 = arith.constant dense<0.000000e+00> : vector<16xf32>
    %32 = vector.multi_reduction <add>, %31, %cst_13 [1] : vector<16x16xf32> to vector<16xf32>
    %33 = vector.shape_cast %32 : vector<16xf32> to vector<16x1xf32>
    %34 = tpu.reciprocal %33 {approx = true} : vector<16x1xf32> -> vector<16x1xf32>
    %35 = vector.broadcast %34 : vector<16x1xf32> to vector<16x16xf32>
    %36 = arith.mulf %31, %35 : vector<16x16xf32>
    %cst_14 = arith.constant dense<0.000000e+00> : vector<32x16xf32>
    %37 = tpu.matmul %25, %36, %cst_14 {dimension_numbers = #tpu.dot_dimension_numbers<[1], [1], [0], [0], [0, 0, 1, 0], [], []>} : vector<32x16xf32>, vector<16x16xf32>, vector<32x16xf32> -> vector<32x16xf32>
    %38 = vector.shape_cast %22 : vector<32x16xf32> to vector<1x32x16xf32>
    %39 = vector.shape_cast %37 : vector<32x16xf32> to vector<1x32x16xf32>
    %40 = tpu.concatenate %38, %39 in 0 : vector<1x32x16xf32>, vector<1x32x16xf32> -> vector<2x32x16xf32>
    %41 = vector.broadcast %6 : f32 to vector<2x32x16xf32>
    %42 = arith.mulf %41, %40 : vector<2x32x16xf32>
    %43 = arith.addf %7, %42 : vector<2x32x16xf32>
    %c0_15 = arith.constant 0 : index
    %c0_16 = arith.constant 0 : index
    %c0_17 = arith.constant 0 : index
    %44 = vector.load %arg5[%c0_15, %c0_16, %c0_17] : memref<2x32x16xf32, #tpu.memory_space<vmem>>, vector<2x32x16xf32>
    tpu.vector_store %arg5[%c0_15, %c0_16, %c0_17], %43 {strides = array<i32>} : memref<2x32x16xf32, #tpu.memory_space<vmem>>, vector<2x32x16xf32>,
    return
  }
  func.func @transform_0(%arg0: i32) -> i32 {
    %c0_i32 = arith.constant 0 : i32
    %c0_i32_0 = arith.constant 0 : i32
    return %c0_i32 : i32
  }
  func.func @transform_1(%arg0: i32) -> (i32, i32, i32) {
    %c0_i32 = arith.constant 0 : i32
    %c0_i32_0 = arith.constant 0 : i32
    %c0_i32_1 = arith.constant 0 : i32
    %c0_i32_2 = arith.constant 0 : i32
    return %c0_i32, %c0_i32_0, %c0_i32_1 : i32, i32, i32
  }
  func.func @transform_2(%arg0: i32) -> (i32, i32) {
    %c0_i32 = arith.constant 0 : i32
    %c0_i32_0 = arith.constant 0 : i32
    %c0_i32_1 = arith.constant 0 : i32
    return %c0_i32, %c0_i32_0 : i32, i32
  }
  func.func @transform_3(%arg0: i32) -> (i32, i32) {
    %c0_i32 = arith.constant 0 : i32
    %c0_i32_0 = arith.constant 0 : i32
    %c0_i32_1 = arith.constant 0 : i32
    return %c0_i32, %c0_i32_0 : i32, i32
  }
  func.func @transform_4(%arg0: i32) -> (i32, i32, i32) {
    %c0_i32 = arith.constant 0 : i32
    %c0_i32_0 = arith.constant 0 : i32
    %c0_i32_1 = arith.constant 0 : i32
    %c0_i32_2 = arith.constant 0 : i32
    return %c0_i32, %c0_i32_0, %c0_i32_1 : i32, i32, i32
  }
}

</mosaic_0001>

<bundles_post_ra>
// kernel: tpu_custom_call.1
= control target key start
LH: loop header
LB: loop body
LE: loop exit
PB: predicated region body
PF: predicated region fallthrough
CT: control target
= control target key end

     0   :  { %vm28_vm0 = vcmask 261120   ;;  %vm123_vm1 = vcmask 64512   ;;  %vm153_vm2 = vcmask 130048   ;;  %s586_s2 = inlined_call_operand.vmem [shape: f32[32,32], index: 2, kind: input, shape index: {}]   ;;  %s587_s3 = inlined_call_operand.vmem [shape: f32[48,32], index: 3, kind: input, shape index: {}]   ;;  %s588_s0 = inlined_call_operand.<no memory space> [shape: f32[1], index: 0, kind: input, shape index: {}]   ;;  %s589_s1 = inlined_call_operand.vmem [shape: f32[2,32,16], index: 1, kind: input, shape index: {}]   ;;  %s590_s4 = inlined_call_operand.vmem [shape: f32[2,32,16], index: 4, kind: output, shape index: {}]  }
   0x1   :  { %v21_v0 = vld [vmem:[%s586_s2 + $0x18] sm:$0xff]  ;;  %v20_v1 = vld [vmem:[%s586_s2 + $0x10] sm:$0xff]  ;;  %v19_v2 = vld [vmem:[%s586_s2 + $0x8] sm:$0xff] }
   0x2   :  { %59 = vmatpush.msra.mxu0 %v21_v0  ;;  %416 = vmatpush.msra.mxu3 %v21_v0  ;;  %v18_v3 = vld [vmem:[%s586_s2] sm:$0xff]  ;;  %v23_v5 = vld [vmem:[%s587_s3 + $0x8] sm:$0xff]  ;;  %s439_s2 = smov 112   ;;  %v24_v13 = vld [vmem:[%s587_s3 + $0x10] sm:$0xff] }
   0x3   :  { %v22_v4 = vld [vmem:[%s587_s3] sm:$0xff]  ;;  %v27_v8 = vld [vmem:[%s587_s3 + $0x28] sm:$0xff]  ;;  %v25_v15 = vld [vmem:[%s587_s3 + $0x18] sm:$0xff] }
   0x4   :  { %60 = vmatpush.msra.mxu0 %v20_v1  ;;  %417 = vmatpush.msra.mxu3 %v20_v1  ;;  %v26_v27 = vld [vmem:[%s587_s3 + $0x20] sm:$0xff]  ;;  %v365_v1 = vstv %s588_s0 }
   0x6   :  { %61 = vmatpush.msra.mxu0 %v19_v2  ;;  %418 = vmatpush.msra.mxu3 %v19_v2  ;;  %v83_v2 = vld [vmem:[%s589_s1] sm:$0xff] }
   0x8   :  { %62 = vmatpush.msra.mxu0 %v18_v3  ;;  %419 = vmatpush.msra.mxu3 %v18_v3 }
   0x9   :  { %394 = vmatmul.msk.f32.vlgmr.msra.gmra.mxu0 %vm28_vm0, %v22_v4  ;;  %399 = vmatmul.msk.f32.vlgmr.msra.gmra.mxu3 %vm28_vm0, %v27_v8 }
  0x11   :  { %395 = vmatmul.msk.f32.gmra.mxu0 %vm28_vm0, %v23_v5 }
  0x19   :  { %396 = vmatmul.msk.f32.gmra.mxu0 %vm28_vm0, %v24_v13 }
  0x21   :  { %397 = vmatmul.msk.f32.gmra.mxu0 %vm28_vm0, %v25_v15  ;;  %v86_v15 = vld [vmem:[%s589_s1 + $0x18] sm:$0xff] }
  0x29   :  { %398 = vmatmul.msk.f32.gmra.mxu0 %vm28_vm0, %v26_v27  ;;  %v89_v27 = vld [vmem:[%s589_s1 + $0x30] sm:$0xff] }
  0x86   :  { %v64_v6 = vpop.f32.mrf.mxu0 }
  0x87   :  { %145 = vmatpush.msra.mxu1 %v64_v6  ;;  %420 = vmatpush.msrb.mxu3 %v64_v6 }
  0x8c   :  { %v79_v19 = vpop.f32.mrf.mxu3 }
  0x8e   :  { %v67_v7 = vpop.f32.mrf.mxu0 }
  0x8f   :  { %91 = vxpose.xlu1.b32.start.end [1/1] (short) (narrow) %v67_v7, 16  ;;  %224 = vrot.lane.b32.xlu0 %v67_v7, %s439_s2  ;;  %v84_v7 = vld [vmem:[%s589_s1 + $0x8] sm:$0xff] }
  0x96   :  { %v70_v35 = vpop.f32.mrf.mxu0 }
  0x97   :  { %260 = vrot.lane.b32.xlu0 %v64_v6, %s439_s2 }
  0x9e   :  { %v73_v38 = vpop.f32.mrf.mxu0 }
  0xa6   :  { %v76_v55 = vpop.f32.mrf.mxu0 }
 0x101   :  { %v225_v9 = vpop.permute.xlu0 %224 }
 0x102   :  { %227 = vxpose.xlu1.b32.start.end [1/1] (short) (narrow) %v225_v9, 16 }
 0x109   :  { %v261_v10 = vpop.permute.xlu0 %260 }
 0x10a   :  { %284 = vmatpush.msra.mxu3 %v261_v10 }
 0x133   :  { %v107_v11 = vpop.trf.xlu1 }
 0x134   :  { %400 = vmatmul.msk.f32.vlgmr.msra.gmra.mxu1 %vm123_vm1, %v107_v11  ;;  %v85_v11 = vld [vmem:[%s589_s1 + $0x10] sm:$0xff] }
 0x13b   :  { %v108_v12 = vpop.trf.xlu1 }
 0x13c   :  { %401 = vmatmul.msk.f32.vlgmr.msrb.gmra.mxu3 %vm123_vm1, %v108_v12 }
 0x1a6   :  { %v243_v14 = vpop.trf.xlu1 }
 0x1a7   :  { %408 = vmatmul.msk.f32.vlgmr.msra.gmra.mxu3 %vm123_vm1, %v243_v14 }
 0x1ae   :  { %v244_v16 = vpop.trf.xlu1 }
 0x1af   :  { %409 = vmatmul.msk.f32.gmra.mxu3 %vm123_vm1, %v244_v16 }
 0x1b1   :  { %v147_v17 = vpop.f32.mrf.mxu1 }
 0x1b2   :  { %v154_v18 = vsel %vm153_vm2, %v147_v17, -inf }
 0x1b3   :  { %155 = vmax.xlane.f32.xlu2 %v154_v18 }
 0x1bf   :  { %v150_v20 = vpop.f32.mrf.mxu3 }
 0x1c0   :  { %v157_v21 = vsel %vm153_vm2, %v150_v20, -inf }
 0x1c1   :  { %158 = vmax.xlane.f32.xlu2 %v157_v21 }
 0x226   :  { %v156_v22 = vpop.xlane.xlu2 %155 }
 0x227   :  { %v160_v23 = vsub.f32 %v147_v17, %v156_v22 }
 0x229   :  { %v162_v24 = vmul.f32 1.442695, %v160_v23  ;;  %v88_v23 = vld [vmem:[%s589_s1 + $0x28] sm:$0xff] }
 0x22a   :  { %v286_v25 = vpop.f32.mrf.mxu3 }
 0x22b   :  { %423 = vpow2.f32 %v162_v24  ;;  %v292_v26 = vsel %vm153_vm2, %v286_v25, -inf }
 0x22c   :  { %293 = vmax.xlane.f32.xlu2 %v292_v26 }
 0x231   :  { %v424_v28 = vpop.eup %423 }
 0x232   :  { %v289_v29 = vpop.f32.mrf.mxu3  ;;  %v166_v30 = vsel %vm153_vm2, %v424_v28, 0.0 }
 0x233   :  { %v295_v31 = vsel %vm153_vm2, %v289_v29, -inf }
 0x234   :  { %v159_v32 = vpop.xlane.xlu2 %158  ;;  %167 = vadd.xlane.f32.xlu2 %v166_v30  ;;  %296 = vmax.xlane.f32.xlu0 %v295_v31  ;;  %v90_v31 = vld [vmem:[%s589_s1 + $0x38] sm:$0xff] }
 0x235   :  { %v161_v33 = vsub.f32 %v150_v20, %v159_v32 }
 0x237   :  { %v164_v34 = vmul.f32 1.442695, %v161_v33 }
 0x239   :  { %425 = vpow2.f32 %v164_v34 }
 0x23f   :  { %v426_v36 = vpop.eup %425 }
 0x240   :  { %v169_v37 = vsel %vm153_vm2, %v426_v36, 0.0 }
 0x241   :  { %170 = vadd.xlane.f32.xlu1 %v169_v37 }
 0x248   :  { %316 = vrot.lane.b32.xlu0 %v73_v38, %s439_s2 }
 0x24c   :  { %314 = vrot.lane.b32.xlu2 %v70_v35, %s439_s2 }
 0x250   :  { %320 = vrot.lane.b32.xlu0 %v79_v19, %s439_s2 }
 0x29f   :  { %v294_v39 = vpop.xlane.xlu2 %293 }
 0x2a0   :  { %v298_v40 = vsub.f32 %v286_v25, %v294_v39 }
 0x2a2   :  { %v300_v41 = vmul.f32 1.442695, %v298_v40 }
 0x2a4   :  { %427 = vpow2.f32 %v300_v41 }
 0x2a7   :  { %v297_v42 = vpop.xlane.xlu0 %296  ;;  %v168_v49 = vpop.xlane.xlu2 %167 }
 0x2a8   :  { %v299_v43 = vsub.f32 %v289_v29, %v297_v42 }
 0x2aa   :  { %v428_v44 = vpop.eup %427  ;;  %v302_v45 = vmul.f32 1.442695, %v299_v43 }
 0x2ab   :  { %v304_v46 = vsel %vm153_vm2, %v428_v44, 0.0 }
 0x2ac   :  { %429 = vpow2.f32 %v302_v45  ;;  %305 = vadd.xlane.f32.xlu2 %v304_v46 }
 0x2af   :  { %v315_v56 = vpop.permute.xlu2 %314 }
 0x2b2   :  { %v430_v47 = vpop.eup %429 }
 0x2b3   :  { %v307_v48 = vsel %vm153_vm2, %v430_v47, 0.0 }
 0x2b4   :  { %v171_v50 = vpop.xlane.xlu1 %170  ;;  %308 = vadd.xlane.f32.xlu2 %v307_v48 }
 0x2b5   :  { %431 = vrcp.f32 %v171_v50 }
 0x2b6   :  { %433 = vrcp.f32 %v168_v49 }
 0x2ba   :  { %v317_v63 = vpop.permute.xlu0 %316 }
 0x2bb   :  { %v432_v51 = vpop.eup %431 }
 0x2bc   :  { %v175_v52 = vmul.f32 %v432_v51, %v426_v36  ;;  %v434_v53 = vpop.eup %433 }
 0x2bd   :  { %v174_v54 = vmul.f32 %v434_v53, %v424_v28 }
 0x2be   :  { %402 = vmatpush.xpose.msk.msra.mxu2 %vm153_vm2, %v175_v52 }
 0x2c2   :  { %403 = vmatpush.xpose.msk.msra.mxu2 %vm153_vm2, %v174_v54  ;;  %v321_v6 = vpop.permute.xlu0 %320 }
 0x2c5   :  { %404 = vmatmul.msk.f32.vlgmr.msra.gmra.mxu2 %vm153_vm2, %v70_v35 }
 0x2cc   :  { %318 = vrot.lane.b32.xlu2 %v76_v55, %s439_s2 }
 0x2cd   :  { %405 = vmatmul.msk.f32.gmra.mxu2 %vm153_vm2, %v73_v38 }
 0x2d5   :  { %406 = vmatmul.msk.f32.gmra.mxu2 %vm153_vm2, %v76_v55 }
 0x2dd   :  { %407 = vmatmul.msk.f32.gmra.mxu2 %vm153_vm2, %v79_v19  ;;  %v87_v19 = vld [vmem:[%s589_s1 + $0x20] sm:$0xff] }
 0x31f   :  { %v306_v57 = vpop.xlane.xlu2 %305 }
 0x327   :  { %v309_v58 = vpop.xlane.xlu2 %308 }
 0x328   :  { %435 = vrcp.f32 %v309_v58 }
 0x329   :  { %437 = vrcp.f32 %v306_v57 }
 0x32e   :  { %v436_v59 = vpop.eup %435 }
 0x32f   :  { %v313_v60 = vmul.f32 %v436_v59, %v430_v47  ;;  %v438_v61 = vpop.eup %437  ;;  %v319_v0 = vpop.permute.xlu2 %318 }
 0x330   :  { %v312_v62 = vmul.f32 %v438_v61, %v428_v44 }
 0x331   :  { %410 = vmatpush.xpose.msk.msrb.mxu1 %vm153_vm2, %v313_v60 }
 0x335   :  { %411 = vmatpush.xpose.msk.msrb.mxu1 %vm153_vm2, %v312_v62 }
 0x338   :  { %412 = vmatmul.msk.f32.vlgmr.msrb.gmra.mxu1 %vm153_vm2, %v315_v56 }
 0x340   :  { %413 = vmatmul.msk.f32.gmra.mxu1 %vm153_vm2, %v317_v63 }
 0x348   :  { %v211_v3 = vpop.f32.mrf.mxu2  ;;  %414 = vmatmul.msk.f32.gmra.mxu1 %vm153_vm2, %v319_v0 }
 0x349   :  { %v366_v4 = vmul.f32 %v365_v1, %v211_v3 }
 0x34b   :  { %v374_v5 = vadd.f32 %v366_v4, %v83_v2 }
 0x34d   :  { %382 = vst.msk [vmem:[%s590_s4] sm:$0xff] %vm153_vm2, %v374_v5 }
 0x350   :  { %v214_v8 = vpop.f32.mrf.mxu2  ;;  %415 = vmatmul.msk.f32.gmra.mxu1 %vm153_vm2, %v321_v6 }
 0x351   :  { %v367_v9 = vmul.f32 %v365_v1, %v214_v8 }
 0x353   :  { %v375_v10 = vadd.f32 %v367_v9, %v84_v7 }
 0x355   :  { %383 = vst.msk [vmem:[%s590_s4 + $0x8] sm:$0xff] %vm153_vm2, %v375_v10 }
 0x358   :  { %v217_v12 = vpop.f32.mrf.mxu2 }
 0x359   :  { %v368_v13 = vmul.f32 %v365_v1, %v217_v12 }
 0x35b   :  { %v376_v14 = vadd.f32 %v368_v13, %v85_v11 }
 0x35d   :  { %384 = vst.msk [vmem:[%s590_s4 + $0x10] sm:$0xff] %vm153_vm2, %v376_v14 }
 0x360   :  { %v220_v16 = vpop.f32.mrf.mxu2 }
 0x361   :  { %v369_v17 = vmul.f32 %v365_v1, %v220_v16 }
 0x363   :  { %v377_v18 = vadd.f32 %v369_v17, %v86_v15 }
 0x365   :  { %385 = vst.msk [vmem:[%s590_s4 + $0x18] sm:$0xff] %vm153_vm2, %v377_v18 }
 0x3b5   :  { %v353_v20 = vpop.f32.mrf.mxu1 }
 0x3b6   :  { %v370_v21 = vmul.f32 %v365_v1, %v353_v20 }
 0x3b8   :  { %v378_v22 = vadd.f32 %v370_v21, %v87_v19 }
 0x3ba   :  { %386 = vst.msk [vmem:[%s590_s4 + $0x20] sm:$0xff] %vm153_vm2, %v378_v22 }
 0x3bd   :  { %v356_v24 = vpop.f32.mrf.mxu1 }
 0x3be   :  { %v371_v25 = vmul.f32 %v365_v1, %v356_v24 }
 0x3c0   :  { %v379_v26 = vadd.f32 %v371_v25, %v88_v23 }
 0x3c2   :  { %387 = vst.msk [vmem:[%s590_s4 + $0x28] sm:$0xff] %vm153_vm2, %v379_v26 }
 0x3c5   :  { %v359_v28 = vpop.f32.mrf.mxu1 }
 0x3c6   :  { %v372_v29 = vmul.f32 %v365_v1, %v359_v28 }
 0x3c8   :  { %v380_v30 = vadd.f32 %v372_v29, %v89_v27 }
 0x3ca   :  { %388 = vst.msk [vmem:[%s590_s4 + $0x30] sm:$0xff] %vm153_vm2, %v380_v30 }
 0x3cd   :  { %v362_v32 = vpop.f32.mrf.mxu1 }
 0x3ce   :  { %v373_v33 = vmul.f32 %v365_v1, %v362_v32 }
 0x3d0   :  { %v381_v34 = vadd.f32 %v373_v33, %v90_v31 }
 0x3d2   :  { %389 = vst.msk [vmem:[%s590_s4 + $0x38] sm:$0xff] %vm153_vm2, %v381_v34 }

</bundles_post_ra>
